<compile_context>
chip_gen: v7x
topology: tpu7x:2x2x1
jax: 0.10.0
libtpu: 0.0.40
codegen_flags: <defaults>
</compile_context>

<pallas_src>
import functools

import jax
import jax.numpy as jnp
from jax.experimental import pallas as pl
from jax.experimental.pallas import tpu as pltpu


_MIN_VMEM = 16 << 20     # v5e scoped default is 16 MiB -> always request at least this
_MAX_VMEM = 60 << 20     # stay under v7x's 64 MiB physical VMEM


def _vmem_limit(nbytes):
    return int(min(max(int(nbytes), _MIN_VMEM), _MAX_VMEM))


# --------------------------------- linear ----------------------------------

def _linear_kernel(x_ref, w_ref, b_ref, o_ref):
    # y = x @ w + b ; bf16 MXU operands, f32 accumulation, f32 bias add.
    x = x_ref[...].astype(jnp.bfloat16)
    w = w_ref[...].astype(jnp.bfloat16)
    acc = jnp.dot(x, w, preferred_element_type=jnp.float32)
    o_ref[...] = (acc + b_ref[...]).astype(o_ref.dtype)


def linear(x, w, b, *, row_block=256):
    """x: (M, K) f32, w: (K, N) (bf16 preferred), b: (N,) f32 -> (M, N) f32."""
    M, K = x.shape
    N = w.shape[1]
    tm = M if M <= row_block else row_block          # ragged last block handled by cdiv
    grid = (pl.cdiv(M, tm),)
    # TODO(synk): for very large N (>~6K output features) add an N-tile grid
    # axis instead of keeping the whole (K, N) weight resident in VMEM.
    need = (2 * tm * K * x.dtype.itemsize            # double-buffered x blocks
            + 2 * K * N * w.dtype.itemsize           # weight (pipeline buffers)
            + 2 * tm * N * 4                         # f32 output blocks
            + (4 << 20))
    return pl.pallas_call(
        _linear_kernel,
        out_shape=jax.ShapeDtypeStruct((M, N), x.dtype),
        grid=grid,
        in_specs=[
            pl.BlockSpec((tm, K), lambda i: (i, 0)),
            pl.BlockSpec((K, N), lambda i: (0, 0)),
            pl.BlockSpec((1, N), lambda i: (0, 0)),
        ],
        out_specs=pl.BlockSpec((tm, N), lambda i: (i, 0)),
        compiler_params=pltpu.CompilerParams(
            dimension_semantics=("parallel",),
            vmem_limit_bytes=_vmem_limit(need)),
    )(x, w, b.reshape(1, N))


# ------------------------------- attention ---------------------------------

def _mha_math(q, k, v, *, num_heads, scale):
    """q: (Gb, Lq, dim), k/v: (Gb, Lk, dim) f32, heads packed on the channel
    (lane) axis.  Heads are split with static lane slices; QK^T and PV use
    bf16 MXU operands with f32 accumulation; softmax stays f32; normalization
    happens AFTER the PV matmul (Lq*d multiplies instead of Lq*Lk)."""
    Gb, Lq, dim = q.shape
    d = dim // num_heads
    q = q * scale                       # fold scale into q (fewer elems than scores)
    outs = []
    # TODO(synk): with head_dim << MXU depth (e.g. 8) these are shallow
    # matmuls; a VPU broadcast-mul + XLU-reduce formulation would win at such
    # toy shapes, but real configs (head_dim >= 128) want the MXU path kept.
    for h in range(num_heads):
        sl = slice(h * d, (h + 1) * d)
        qh = q[:, :, sl].astype(jnp.bfloat16)
        kh = k[:, :, sl].astype(jnp.bfloat16)
        vh = v[:, :, sl].astype(jnp.bfloat16)
        s = jnp.einsum('bqd,bkd->bqk', qh, kh,
                       preferred_element_type=jnp.float32)
        s = s - jnp.max(s, axis=-1, keepdims=True)
        p = jnp.exp(s)
        inv = pl.reciprocal(jnp.sum(p, axis=-1, keepdims=True), approx=False)
        oh = jnp.einsum('bqk,bkd->bqd', p.astype(jnp.bfloat16), vh,
                        preferred_element_type=jnp.float32)
        outs.append(oh * inv)           # normalize after PV
    # One lane-dense (Gb, Lq, dim) result -> unmasked store by the caller.
    return jnp.concatenate(outs, axis=-1)


def _mha_packed_kernel(qkv_ref, o_ref, *, num_heads, scale):
    # qkv_ref: (3, Gb, L, dim) — q/k/v stacked on the leading axis (free split).
    o_ref[...] = _mha_math(qkv_ref[0], qkv_ref[1], qkv_ref[2],
                           num_heads=num_heads, scale=scale).astype(o_ref.dtype)


def _mha_kernel(q_ref, k_ref, v_ref, o_ref, *, num_heads, scale):
    o_ref[...] = _mha_math(q_ref[...], k_ref[...], v_ref[...],
                           num_heads=num_heads, scale=scale).astype(o_ref.dtype)


def _attn_group_block(G, h, Lq, Lk, dim, budget):
    """Groups per grid step, budgeting the FULL live set (scores + probs +
    f32 out + double-buffered q/k/v/o blocks) and keeping grid >= 2 so both
    v7x TensorCores get work (also bounds VMEM on its 64 MiB)."""
    d = dim // h
    per_g = (4 * h * Lq * Lk * 2                  # scores + probs (f32)
             + 4 * Lq * dim                       # f32 out temp
             + 2 * 4 * (2 * Lq * dim + 2 * Lk * dim))   # 2x-buffered q,o,k,v blocks
    bg = max(1, min(G, budget // max(per_g, 1)))
    if G >= 2:
        bg = min(bg, pl.cdiv(G, 2))
    return int(bg), int(per_g)


def grouped_attention(qkv_g, scale, num_heads, *, vmem_budget=4 << 20):
    """qkv_g: (3, G, L, dim) -> (G, L, dim).  Lane-dense (heads packed) blocks,
    q/k/v read from the same stacked array (one DMA block per step)."""
    _, G, L, dim = qkv_g.shape
    bg, per_g = _attn_group_block(G, num_heads, L, L, dim, vmem_budget)
    kernel = functools.partial(_mha_packed_kernel, num_heads=num_heads, scale=scale)
    return pl.pallas_call(
        kernel,
        out_shape=jax.ShapeDtypeStruct((G, L, dim), qkv_g.dtype),
        grid=(pl.cdiv(G, bg),),
        in_specs=[pl.BlockSpec((3, bg, L, dim), lambda g: (0, g, 0, 0))],
        out_specs=pl.BlockSpec((bg, L, dim), lambda g: (g, 0, 0)),
        compiler_params=pltpu.CompilerParams(
            dimension_semantics=("parallel",),
            vmem_limit_bytes=_vmem_limit(bg * per_g + (4 << 20))),
    )(qkv_g)


def batched_attention(q, k, v, scale, num_heads, *, vmem_budget=4 << 20):
    """q: (B, Lq, dim), k/v: (B, Lk, dim) -> (B, Lq, dim).  No host-side head
    split/merge: heads are handled inside the kernel, output is 'b n (h d)'."""
    B, Lq, dim = q.shape
    Lk = k.shape[1]
    bg, per_g = _attn_group_block(B, num_heads, Lq, Lk, dim, vmem_budget)
    kernel = functools.partial(_mha_kernel, num_heads=num_heads, scale=scale)
    qspec = pl.BlockSpec((bg, Lq, dim), lambda b: (b, 0, 0))
    kvspec = pl.BlockSpec((bg, Lk, dim), lambda b: (b, 0, 0))
    return pl.pallas_call(
        kernel,
        out_shape=jax.ShapeDtypeStruct((B, Lq, dim), q.dtype),
        grid=(pl.cdiv(B, bg),),
        in_specs=[qspec, kvspec, kvspec],
        out_specs=qspec,
        compiler_params=pltpu.CompilerParams(
            dimension_semantics=("parallel",),
            vmem_limit_bytes=_vmem_limit(bg * per_g + (4 << 20))),
    )(q, k, v)


# ------------------- InterViewSignature conv + residual --------------------

def _ifs_add_kernel(vpad_ref, attn_ref, w_ref, cb_ref, o_ref, *, H, W, C):
    # Fused depthwise 3x3 conv + residual add; (W, C) flattened onto the lane
    # axis: dj shifts are lane offsets, di shifts sublane offsets, and both
    # the loads and the output store are lane-dense (width W*C).
    # vpad: (1, H+2, (W+2)*C), attn: (1, H, W*C), w: (9, W*C), cb: (1, W*C).
    acc = attn_ref[0] + cb_ref[0]                       # (H, W*C) f32
    for di in range(3):
        row = vpad_ref[0, di:di + H, :]                 # (H, (W+2)*C), static slice
        for dj in range(3):
            acc = acc + row[:, dj * C: dj * C + W * C] * w_ref[di * 3 + dj]
    o_ref[0] = acc.astype(o_ref.dtype)


def ifs_add(v_img, attn_img, w33c, bias):
    """out = attn_img + depthwise_conv3x3(v_img) + bias (NHWC, padding=1).
    One batch image per grid step, 'parallel' so both v7x cores get work."""
    B, H, W, C = v_img.shape
    # TODO(synk): halo padding stays a tiny jnp.pad in the wrapper.
    vpad = jnp.pad(v_img, ((0, 0), (1, 1), (1, 1), (0, 0)))
    vpad = vpad.reshape(B, H + 2, (W + 2) * C)
    attn = attn_img.reshape(B, H, W * C)
    w9 = jnp.tile(w33c.reshape(9, 1, C), (1, W, 1)).reshape(9, W * C)
    cb = jnp.tile(bias.reshape(1, 1, C), (1, W, 1)).reshape(1, W * C)
    kernel = functools.partial(_ifs_add_kernel, H=H, W=W, C=C)
    need = 2 * 4 * ((H + 2) * (W + 2) * C + 2 * H * W * C) + (2 << 20)
    out = pl.pallas_call(
        kernel,
        out_shape=jax.ShapeDtypeStruct((B, H, W * C), attn_img.dtype),
        grid=(B,),
        in_specs=[
            pl.BlockSpec((1, H + 2, (W + 2) * C), lambda b: (b, 0, 0)),
            pl.BlockSpec((1, H, W * C), lambda b: (b, 0, 0)),
            pl.BlockSpec((9, W * C), lambda b: (0, 0)),
            pl.BlockSpec((1, W * C), lambda b: (0, 0)),
        ],
        out_specs=pl.BlockSpec((1, H, W * C), lambda b: (b, 0, 0)),
        compiler_params=pltpu.CompilerParams(
            dimension_semantics=("parallel",),
            vmem_limit_bytes=_vmem_limit(need)),
    )(vpad, attn, w9, cb)
    return out.reshape(B, H, W, C)


# ------------------------------- LGAtention --------------------------------

def init_lga_params(key, dim, num_heads, patch_group, qkv_bias=False):
    ks = jax.random.split(key, 8)

    def wmat(k):
        return jax.random.normal(k, (dim, dim), jnp.float32) * 0.02

    wq, wk, wv, wproj = wmat(ks[0]), wmat(ks[1]), wmat(ks[2]), wmat(ks[3])
    bq = jnp.zeros((dim,), jnp.float32)      # qkv_bias=False -> zeros
    bk = jnp.zeros((dim,), jnp.float32)
    bv = jnp.zeros((dim,), jnp.float32)
    bproj = jax.random.normal(ks[4], (dim,), jnp.float32) * 0.02
    # Conv2d(dim, dim, 3, padding=1, groups=dim): weight (dim, 1, 3, 3).
    ifs_w = jax.random.normal(ks[5], (dim, 1, 3, 3), jnp.float32) * 0.1
    ifs_b = jax.random.normal(ks[6], (dim,), jnp.float32) * 0.02

    return {
        'dim': dim, 'num_heads': num_heads, 'group_num': patch_group,
        'qkv_bias': qkv_bias,
        # Reference (PyTorch Linear) layouts kept for completeness.
        'wq': wq, 'wk': wk, 'wv': wv, 'bq': bq, 'bk': bk, 'bv': bv,
        'wproj': wproj, 'bproj': bproj, 'ifs_w': ifs_w, 'ifs_b': ifs_b,
        # Pre-fused / pre-transposed / pre-cast (bf16 MXU operand) layouts.
        'w_qkv': jnp.concatenate([wq.T, wk.T, wv.T], axis=1).astype(jnp.bfloat16),
        'b_qkv': jnp.concatenate([bq, bk, bv]),
        'wq_t': wq.T.astype(jnp.bfloat16),
        'w_kv': jnp.concatenate([wk.T, wv.T], axis=1).astype(jnp.bfloat16),
        'b_kv': jnp.concatenate([bk, bv]),
        'wproj_t': wproj.T.astype(jnp.bfloat16),
        'ifs_w_hwc': ifs_w.reshape(dim, 3, 3).transpose(1, 2, 0),  # (3, 3, dim)
    }


def lga_attention_forward(params, x, view_num=None, context=None,
                          mask=None, lga=False):
    if mask is not None:
        # TODO(synk): additive attention mask not plumbed into the kernels.
        raise NotImplementedError("additive attention mask is not supported")

    B, N, dim = x.shape
    num_heads = params['num_heads']
    head_dim = dim // num_heads
    scale = head_dim ** (-0.5)
    S = params['group_num']

    x2d = x.reshape(B * N, dim)
    if context is None:
        # One fused pallas_call for q|k|v (1 launch, 1 HBM round trip).
        qkv = linear(x2d, params['w_qkv'], params['b_qkv'])      # (B*N, 3*dim)
        q = k = v = None
    else:
        Bk, Nk, _ = context.shape
        qkv = None
        q = linear(x2d, params['wq_t'], params['bq']).reshape(B, N, dim)
        kv = linear(context.reshape(Bk * Nk, dim), params['w_kv'], params['b_kv'])
        k = kv[:, :dim].reshape(Bk, Nk, dim)
        v = kv[:, dim:].reshape(Bk, Nk, dim)

    if lga:
        assert view_num is not None, "view_num is required when lga=True"
        V = view_num
        b_s = B // V
        T = 14 // S                     # token_num (hard-coded 14, as in spec)
        hw = T * S
        assert N == hw * hw, "sequence length inconsistent with grouping"
        G, L = b_s * S * S, T * T * V

        # Single rearrange of the PACKED qkv tensor (instead of 3 separate 8-D
        # transposes of q, k, v):
        #   '(b v)(t1 s1 t2 s2)(3 dim) -> 3 (b s1 s2) (t1 t2 v) dim'
        # TODO(synk): the (s1,s2)<->(t1,t2,v) regrouping is a strided scatter,
        # not expressible as a Blocked index_map, so it stays one XLA transpose.
        if context is None:
            v_src = qkv[:, 2 * dim:]
            qkv_g = (qkv.reshape(b_s, V, T, S, T, S, 3, dim)
                        .transpose(6, 0, 3, 5, 2, 4, 1, 7))
        else:
            v_src = v.reshape(B * N, dim)
            qkv_g = (jnp.stack([q, k, v])
                        .reshape(3, b_s, V, T, S, T, S, dim)
                        .transpose(0, 1, 4, 6, 3, 5, 2, 7))
        qkv_g = qkv_g.reshape(3, G, L, dim)

        out_g = grouped_attention(qkv_g, scale, num_heads)       # (G, L, dim)

        # '(b s1 s2)(t1 t2 v) dim -> (b v)(t1 s1)(t2 s2) dim'  (NHWC image).
        attn_img = out_g.reshape(b_s, S, S, T, T, V, dim)
        attn_img = attn_img.transpose(0, 5, 3, 1, 4, 2, 6).reshape(B, hw, hw, dim)

        # v is already '(h d)' channel-packed -> the NHWC image is a free view.
        v_img = v_src.reshape(B, hw, hw, dim)

        # InterViewSignature (depthwise 3x3 conv of v) fused with residual add.
        y = ifs_add(v_img, attn_img, params['ifs_w_hwc'], params['ifs_b'])
        y = y.reshape(B * N, dim)
    else:
        if context is None:
            q = qkv[:, :dim].reshape(B, N, dim)
            k = qkv[:, dim:2 * dim].reshape(B, N, dim)
            v = qkv[:, 2 * dim:].reshape(B, N, dim)
        # Heads split inside the kernel -> no 'b n (h d) -> b h n d' transposes
        # and the output comes back directly in 'b n (h d)' order.
        y = batched_attention(q, k, v, scale, num_heads).reshape(B * N, dim)

    out = linear(y, params['wproj_t'], params['bproj']).reshape(B, N, dim)
    return out


# ----------------------------------- main -----------------------------------

if __name__ == "__main__":
    key = jax.random.PRNGKey(0)
    kp, kx = jax.random.split(key)

    dim = 32
    num_heads = 4
    patch_group = 5           # token_num = 14 // 5 = 2 -> N = (2*5)^2 = 100
    view_num = 2
    b_s = 1
    B = b_s * view_num
    token_num = 14 // patch_group
    N = (token_num * patch_group) ** 2

    params = init_lga_params(kp, dim, num_heads, patch_group, qkv_bias=False)
    x = jax.random.normal(kx, (B, N, dim), jnp.float32)

    # LGA (grouped attention + InterViewSignature) path.
    out = lga_attention_forward(params, x, view_num=view_num, lga=True)
    out = jax.block_until_ready(out)
    assert out.shape == (B, N, dim) and out.dtype == jnp.float32
    assert bool(jnp.all(jnp.isfinite(out)))

    # Plain (non-LGA) attention path.
    out2 = lga_attention_forward(params, x, lga=False)
    out2 = jax.block_until_ready(out2)
    assert out2.shape == (B, N, dim)
    assert bool(jnp.all(jnp.isfinite(out2)))

    print("KERNEL_OK")
</pallas_src>

<mosaic_0001>
module attributes {stable_mosaic.version = 11 : i64} {
  func.func @_linear_kernel(%arg0: i32, %arg1: memref<200x32xf32, #tpu.memory_space<vmem>>, %arg2: memref<32x96xbf16, #tpu.memory_space<vmem>>, %arg3: memref<1x96xf32, #tpu.memory_space<vmem>>, %arg4: memref<200x96xf32, #tpu.memory_space<vmem>>) attributes {dimension_semantics = [#tpu.dimension_semantics<parallel>], iteration_bounds = array<i64: 1>, scalar_prefetch = 0 : i64, scratch_operands = 0 : i64, tpu.core_type = #tpu.core_type<tc>, window_params = [{transform_indices = @transform_0, window_bounds = array<i64: 200, 32>}, {pipeline_mode = #tpu.pipeline_mode<synchronous>, transform_indices = @transform_1, window_bounds = array<i64: 32, 96>}, {pipeline_mode = #tpu.pipeline_mode<synchronous>, transform_indices = @transform_2, window_bounds = array<i64: 1, 96>}, {transform_indices = @transform_3, window_bounds = array<i64: 200, 96>}]} {
    %c0 = arith.constant 0 : index
    %c0_0 = arith.constant 0 : index
    %0 = vector.load %arg1[%c0, %c0_0] : memref<200x32xf32, #tpu.memory_space<vmem>>, vector<200x32xf32>
    %1 = arith.truncf %0 : vector<200x32xf32> to vector<200x32xbf16>
    %c0_1 = arith.constant 0 : index
    %c0_2 = arith.constant 0 : index
    %2 = vector.load %arg2[%c0_1, %c0_2] : memref<32x96xbf16, #tpu.memory_space<vmem>>, vector<32x96xbf16>
    %cst = arith.constant dense<0.000000e+00> : vector<200x96xf32>
    %3 = tpu.matmul %1, %2, %cst {dimension_numbers = #tpu.dot_dimension_numbers<[1], [0], [0], [1], [0, 0, 1, 1], [], []>} : vector<200x32xbf16>, vector<32x96xbf16>, vector<200x96xf32> -> vector<200x96xf32>
    %c0_3 = arith.constant 0 : index
    %c0_4 = arith.constant 0 : index
    %4 = vector.load %arg3[%c0_3, %c0_4] : memref<1x96xf32, #tpu.memory_space<vmem>>, vector<1x96xf32>
    %5 = vector.broadcast %4 : vector<1x96xf32> to vector<200x96xf32>
    %6 = arith.addf %3, %5 : vector<200x96xf32>
    %c0_5 = arith.constant 0 : index
    %c0_6 = arith.constant 0 : index
    %7 = vector.load %arg4[%c0_5, %c0_6] : memref<200x96xf32, #tpu.memory_space<vmem>>, vector<200x96xf32>
    tpu.vector_store %arg4[%c0_5, %c0_6], %6 {strides = array<i32>} : memref<200x96xf32, #tpu.memory_space<vmem>>, vector<200x96xf32>,
    return
  }
  func.func @transform_0(%arg0: i32) -> (i32, i32) {
    %c0_i32 = arith.constant 0 : i32
    %c0_i32_0 = arith.constant 0 : i32
    return %arg0, %c0_i32 : i32, i32
  }
  func.func @transform_1(%arg0: i32) -> (i32, i32) {
    %c0_i32 = arith.constant 0 : i32
    %c0_i32_0 = arith.constant 0 : i32
    %c0_i32_1 = arith.constant 0 : i32
    return %c0_i32, %c0_i32_0 : i32, i32
  }
  func.func @transform_2(%arg0: i32) -> (i32, i32) {
    %c0_i32 = arith.constant 0 : i32
    %c0_i32_0 = arith.constant 0 : i32
    %c0_i32_1 = arith.constant 0 : i32
    return %c0_i32, %c0_i32_0 : i32, i32
  }
  func.func @transform_3(%arg0: i32) -> (i32, i32) {
    %c0_i32 = arith.constant 0 : i32
    %c0_i32_0 = arith.constant 0 : i32
    return %arg0, %c0_i32 : i32, i32
  }
}

</mosaic_0001>

<bundles_post_ra>
// kernel: tpu_custom_call.1
= control target key start
LH: loop header
LB: loop body
LE: loop exit
PB: predicated region body
PF: predicated region fallthrough
CT: control target
= control target key end

     0   :  { %v377_v0 = vmov 0.0   ;;  %vm378_vm0 = vmmov 0   ;;  %vm76_vm1 = vcmask 261120   ;;  %vm252_vm2 = vcmask 785408   ;;  %s653_s1 = inlined_call_operand.vmem [shape: bf16[32,96], index: 1, kind: input, shape index: {}]   ;;  %s654_s0 = inlined_call_operand.vmem [shape: f32[200,32], index: 0, kind: input, shape index: {}]   ;;  %s655_s2 = inlined_call_operand.vmem [shape: f32[1,96], index: 2, kind: input, shape index: {}]   ;;  %s656_s3 = inlined_call_operand.vmem [shape: f32[200,96], index: 3, kind: output, shape index: {}]  }
   0x1   :  { %313 = vmatprep.subr.bf16.mxu0 %v377_v0  ;;  %v375_v1 = vld [vmem:[%s653_s1] sm:$0xff]   ;;  %369 = vmatprep.subr.bf16.mxu1 %v377_v0  ;;  %v376_v2 = vld [vmem:[%s653_s1 + $0x8] sm:$0xff]   ;;  %v29_v5 = vld [vmem:[%s654_s0 + $0x70] sm:$0xff] }
   0x2   :  { %317 = vmatprep.mubr.msk.bf16.mxu0 %vm378_vm0, %v377_v0  ;;  %345 = vmatprep.mubr.msk.bf16.mxu1 %vm378_vm0, %v377_v0  ;;  %v15_v3 = vld [vmem:[%s654_s0] sm:$0xff]  ;;  %v16_v4 = vld [vmem:[%s654_s0 + $0x8] sm:$0xff]  ;;  %v30_v6 = vld [vmem:[%s654_s0 + $0x78] sm:$0xff] }
   0x3   :  { %314 = vmatpush3.bf16.msra.mxu0 %v375_v1  ;;  %371 = vmatpush3.bf16.msra.mxu1 %v375_v1  ;;  %v40_v7 = vpack.c.bf16 %v16_v4, %v15_v3  ;;  %v47_v8 = vpack.c.bf16 %v30_v6, %v29_v5  ;;  %v17_v9 = vld [vmem:[%s654_s0 + $0x10] sm:$0xff]  ;;  %v18_v10 = vld [vmem:[%s654_s0 + $0x18] sm:$0xff]  ;;  %v31_v11 = vld [vmem:[%s654_s0 + $0x80] sm:$0xff] }
   0x4   :  { %315 = vmatprep.subr.bf16.mxu0 %v377_v0  ;;  %370 = vmatprep.subr.bf16.mxu1 %v377_v0  ;;  %v32_v12 = vld [vmem:[%s654_s0 + $0x88] sm:$0xff]  ;;  %v41_v13 = vpack.c.bf16 %v18_v10, %v17_v9  ;;  %v19_v15 = vld [vmem:[%s654_s0 + $0x20] sm:$0xff]  ;;  %v33_v17 = vld [vmem:[%s654_s0 + $0x90] sm:$0xff] }
   0x5   :  { %v48_v14 = vpack.c.bf16 %v32_v12, %v31_v11  ;;  %v20_v16 = vld [vmem:[%s654_s0 + $0x28] sm:$0xff]  ;;  %v34_v18 = vld [vmem:[%s654_s0 + $0x98] sm:$0xff]  ;;  %v21_v21 = vld [vmem:[%s654_s0 + $0x30] sm:$0xff] }
   0x6   :  { %v42_v19 = vpack.c.bf16 %v20_v16, %v19_v15  ;;  %v49_v20 = vpack.c.bf16 %v34_v18, %v33_v17  ;;  %v22_v22 = vld [vmem:[%s654_s0 + $0x38] sm:$0xff]  ;;  %v35_v23 = vld [vmem:[%s654_s0 + $0xa0] sm:$0xff]  ;;  %v36_v24 = vld [vmem:[%s654_s0 + $0xa8] sm:$0xff] }
   0x7   :  { %316 = vmatpush3.bf16.msra.mxu0 %v376_v2  ;;  %372 = vmatpush3.bf16.msra.mxu1 %v376_v2  ;;  %v43_v25 = vpack.c.bf16 %v22_v22, %v21_v21  ;;  %v50_v26 = vpack.c.bf16 %v36_v24, %v35_v23  ;;  %v23_v27 = vld [vmem:[%s654_s0 + $0x40] sm:$0xff]  ;;  %v24_v28 = vld [vmem:[%s654_s0 + $0x48] sm:$0xff]  ;;  %v37_v29 = vld [vmem:[%s654_s0 + $0xb0] sm:$0xff] }
   0x8   :  { %v38_v30 = vld [vmem:[%s654_s0 + $0xb8] sm:$0xff]  ;;  %v44_v31 = vpack.c.bf16 %v24_v28, %v23_v27  ;;  %v25_v33 = vld [vmem:[%s654_s0 + $0x50] sm:$0xff]  ;;  %v39_v35 = vld [vmem:[%s654_s0 + $0xc0] sm:$0xff] }
   0x9   :  { %v51_v32 = vpack.c.bf16 %v38_v30, %v37_v29  ;;  %v26_v34 = vld [vmem:[%s654_s0 + $0x58] sm:$0xff]  ;;  %v52_v37 = vpack.c.bf16 %v39_v35, %v39_v35  ;;  %v27_v38 = vld [vmem:[%s654_s0 + $0x60] sm:$0xff]  ;;  %v28_v39 = vld [vmem:[%s654_s0 + $0x68] sm:$0xff] }
   0xa   :  { %318 = vmatmul.mubr.msk.bf16.vlgmr.msra.gmra.mrb[0].mxu0 %vm76_vm1, %v40_v7  ;;  %346 = vmatmul.mubr.msk.bf16.vlgmr.msra.gmra.mrb[0].mxu1 %vm76_vm1, %v47_v8  ;;  %v45_v36 = vpack.c.bf16 %v26_v34, %v25_v33  ;;  %v46_v40 = vpack.c.bf16 %v28_v39, %v27_v38  ;;  %v526_v41 = vld [vmem:[%s655_s2] ss:$0 sm:$0xff] }
   0xb   :  { %321 = vmatprep.mubr.msk.bf16.mxu0 %vm378_vm0, %v377_v0  ;;  %349 = vmatprep.mubr.msk.bf16.mxu1 %vm378_vm0, %v377_v0 }
  0x12   :  { %322 = vmatmul.mubr.msk.bf16.gmra.mrb[4].mxu0 %vm76_vm1, %v41_v13  ;;  %350 = vmatmul.mubr.msk.bf16.gmra.mrb[4].mxu1 %vm76_vm1, %v48_v14 }
  0x13   :  { %325 = vmatprep.mubr.msk.bf16.mxu0 %vm378_vm0, %v377_v0  ;;  %353 = vmatprep.mubr.msk.bf16.mxu1 %vm378_vm0, %v377_v0 }
  0x1a   :  { %326 = vmatmul.mubr.msk.bf16.gmra.mrb[8].mxu0 %vm76_vm1, %v42_v19  ;;  %354 = vmatmul.mubr.msk.bf16.gmra.mrb[8].mxu1 %vm76_vm1, %v49_v20 }
  0x1b   :  { %329 = vmatprep.mubr.msk.bf16.mxu0 %vm378_vm0, %v377_v0  ;;  %357 = vmatprep.mubr.msk.bf16.mxu1 %vm378_vm0, %v377_v0 }
  0x22   :  { %330 = vmatmul.mubr.msk.bf16.gmra.mrb[12].mxu0 %vm76_vm1, %v43_v25  ;;  %358 = vmatmul.mubr.msk.bf16.gmra.mrb[12].mxu1 %vm76_vm1, %v50_v26 }
  0x23   :  { %333 = vmatprep.mubr.msk.bf16.mxu0 %vm378_vm0, %v377_v0  ;;  %361 = vmatprep.mubr.msk.bf16.mxu1 %vm378_vm0, %v377_v0 }
  0x2a   :  { %334 = vmatmul.mubr.msk.bf16.gmra.mrb[16].mxu0 %vm76_vm1, %v44_v31  ;;  %362 = vmatmul.mubr.msk.bf16.gmra.mrb[16].mxu1 %vm76_vm1, %v51_v32 }
  0x2b   :  { %337 = vmatprep.mubr.msk.bf16.mxu0 %vm378_vm0, %v377_v0  ;;  %365 = vmatprep.mubr.msk.bf16.mxu1 %vm378_vm0, %v377_v0 }
  0x32   :  { %338 = vmatmul.mubr.msk.bf16.gmra.mrb[20].mxu0 %vm76_vm1, %v45_v36  ;;  %366 = vmatmul.mubr.msk.bf16.gmra.mrb[20].mxu1 %vm76_vm1, %v52_v37 }
  0x33   :  { %341 = vmatprep.mubr.msk.bf16.mxu0 %vm378_vm0, %v377_v0 }
  0x3a   :  { %342 = vmatmul.mubr.msk.bf16.gmra.mrb[24].mxu0 %vm76_vm1, %v46_v40 }
  0xdd   :  { %v150_v42 = vpop.f32.mrb[0].mxu0  ;;  %v206_v43 = vpop.f32.mrb[0].mxu1 }
  0xde   :  { %v151_v44 = vadd.f32 %v526_v41, %v150_v42  ;;  %v319_v45 = vpop.f32.mrb[1].mxu0  ;;  %v207_v46 = vadd.f32 %v526_v41, %v206_v43  ;;  %v347_v47 = vpop.f32.mrb[1].mxu1 }
  0xdf   :  { %v153_v48 = vpop.f32.mrb[2].mxu0  ;;  %v209_v49 = vpop.f32.mrb[2].mxu1 }
  0xe0   :  { %253 = vst.msk [vmem:[%s656_s3] sm:$0xff] %vm252_vm2, %v151_v44  ;;  %v154_v50 = vadd.f32 %v526_v41, %v153_v48  ;;  %v320_v51 = vpop.f32.mrb[3].mxu0  ;;  %267 = vst.msk [vmem:[%s656_s3 + $0x70] sm:$0xff] %vm252_vm2, %v207_v46  ;;  %v210_v52 = vadd.f32 %v526_v41, %v209_v49  ;;  %v348_v53 = vpop.f32.mrb[3].mxu1 }
  0xe2   :  { %254 = vst.msk [vmem:[%s656_s3 + $0x8] sm:$0xff] %vm252_vm2, %v154_v50  ;;  %268 = vst.msk [vmem:[%s656_s3 + $0x78] sm:$0xff] %vm252_vm2, %v210_v52 }
  0xe5   :  { %v158_v54 = vpop.f32.mrb[4].mxu0  ;;  %v214_v55 = vpop.f32.mrb[4].mxu1 }
  0xe6   :  { %v159_v56 = vadd.f32 %v526_v41, %v158_v54  ;;  %v323_v57 = vpop.f32.mrb[5].mxu0  ;;  %v215_v58 = vadd.f32 %v526_v41, %v214_v55  ;;  %v351_v59 = vpop.f32.mrb[5].mxu1 }
  0xe7   :  { %v161_v60 = vpop.f32.mrb[6].mxu0  ;;  %v217_v61 = vpop.f32.mrb[6].mxu1 }
  0xe8   :  { %255 = vst.msk [vmem:[%s656_s3 + $0x10] sm:$0xff] %vm252_vm2, %v159_v56  ;;  %v162_v62 = vadd.f32 %v526_v41, %v161_v60  ;;  %v324_v63 = vpop.f32.mrb[7].mxu0  ;;  %269 = vst.msk [vmem:[%s656_s3 + $0x80] sm:$0xff] %vm252_vm2, %v215_v58  ;;  %v218_v0 = vadd.f32 %v526_v41, %v217_v61  ;;  %v352_v1 = vpop.f32.mrb[7].mxu1 }
  0xea   :  { %256 = vst.msk [vmem:[%s656_s3 + $0x18] sm:$0xff] %vm252_vm2, %v162_v62  ;;  %270 = vst.msk [vmem:[%s656_s3 + $0x88] sm:$0xff] %vm252_vm2, %v218_v0 }
  0xed   :  { %v166_v2 = vpop.f32.mrb[8].mxu0  ;;  %v222_v3 = vpop.f32.mrb[8].mxu1 }
  0xee   :  { %v167_v4 = vadd.f32 %v526_v41, %v166_v2  ;;  %v327_v5 = vpop.f32.mrb[9].mxu0  ;;  %v223_v6 = vadd.f32 %v526_v41, %v222_v3  ;;  %v355_v7 = vpop.f32.mrb[9].mxu1 }
  0xef   :  { %v169_v8 = vpop.f32.mrb[10].mxu0  ;;  %v225_v9 = vpop.f32.mrb[10].mxu1 }
  0xf0   :  { %257 = vst.msk [vmem:[%s656_s3 + $0x20] sm:$0xff] %vm252_vm2, %v167_v4  ;;  %v170_v10 = vadd.f32 %v526_v41, %v169_v8  ;;  %v328_v11 = vpop.f32.mrb[11].mxu0  ;;  %271 = vst.msk [vmem:[%s656_s3 + $0x90] sm:$0xff] %vm252_vm2, %v223_v6  ;;  %v226_v12 = vadd.f32 %v526_v41, %v225_v9  ;;  %v356_v13 = vpop.f32.mrb[11].mxu1 }
  0xf2   :  { %258 = vst.msk [vmem:[%s656_s3 + $0x28] sm:$0xff] %vm252_vm2, %v170_v10  ;;  %272 = vst.msk [vmem:[%s656_s3 + $0x98] sm:$0xff] %vm252_vm2, %v226_v12 }
  0xf5   :  { %v174_v14 = vpop.f32.mrb[12].mxu0  ;;  %v230_v15 = vpop.f32.mrb[12].mxu1 }
  0xf6   :  { %v175_v16 = vadd.f32 %v526_v41, %v174_v14  ;;  %v331_v17 = vpop.f32.mrb[13].mxu0  ;;  %v231_v18 = vadd.f32 %v526_v41, %v230_v15  ;;  %v359_v19 = vpop.f32.mrb[13].mxu1 }
  0xf7   :  { %v177_v20 = vpop.f32.mrb[14].mxu0  ;;  %v233_v21 = vpop.f32.mrb[14].mxu1 }
  0xf8   :  { %259 = vst.msk [vmem:[%s656_s3 + $0x30] sm:$0xff] %vm252_vm2, %v175_v16  ;;  %v178_v22 = vadd.f32 %v526_v41, %v177_v20  ;;  %v332_v23 = vpop.f32.mrb[15].mxu0  ;;  %273 = vst.msk [vmem:[%s656_s3 + $0xa0] sm:$0xff] %vm252_vm2, %v231_v18  ;;  %v234_v24 = vadd.f32 %v526_v41, %v233_v21  ;;  %v360_v25 = vpop.f32.mrb[15].mxu1 }
  0xfa   :  { %260 = vst.msk [vmem:[%s656_s3 + $0x38] sm:$0xff] %vm252_vm2, %v178_v22  ;;  %274 = vst.msk [vmem:[%s656_s3 + $0xa8] sm:$0xff] %vm252_vm2, %v234_v24 }
  0xfd   :  { %v182_v26 = vpop.f32.mrb[16].mxu0  ;;  %v238_v27 = vpop.f32.mrb[16].mxu1 }
  0xfe   :  { %v183_v28 = vadd.f32 %v526_v41, %v182_v26  ;;  %v335_v29 = vpop.f32.mrb[17].mxu0  ;;  %v239_v30 = vadd.f32 %v526_v41, %v238_v27  ;;  %v363_v31 = vpop.f32.mrb[17].mxu1 }
  0xff   :  { %v185_v32 = vpop.f32.mrb[18].mxu0  ;;  %v241_v33 = vpop.f32.mrb[18].mxu1 }
 0x100   :  { %261 = vst.msk [vmem:[%s656_s3 + $0x40] sm:$0xff] %vm252_vm2, %v183_v28  ;;  %v186_v34 = vadd.f32 %v526_v41, %v185_v32  ;;  %v336_v35 = vpop.f32.mrb[19].mxu0  ;;  %275 = vst.msk [vmem:[%s656_s3 + $0xb0] sm:$0xff] %vm252_vm2, %v239_v30  ;;  %v242_v36 = vadd.f32 %v526_v41, %v241_v33  ;;  %v364_v37 = vpop.f32.mrb[19].mxu1 }
 0x102   :  { %262 = vst.msk [vmem:[%s656_s3 + $0x48] sm:$0xff] %vm252_vm2, %v186_v34  ;;  %276 = vst.msk [vmem:[%s656_s3 + $0xb8] sm:$0xff] %vm252_vm2, %v242_v36 }
 0x105   :  { %v190_v38 = vpop.f32.mrb[20].mxu0  ;;  %v246_v39 = vpop.f32.mrb[20].mxu1 }
 0x106   :  { %v191_v40 = vadd.f32 %v526_v41, %v190_v38  ;;  %v339_v42 = vpop.f32.mrb[21].mxu0  ;;  %v247_v43 = vadd.f32 %v526_v41, %v246_v39  ;;  %v367_v44 = vpop.f32.mrb[21].mxu1 }
 0x107   :  { %v193_v45 = vpop.f32.mrb[22].mxu0  ;;  %v249_v46 = vpop.f32.mrb[22].mxu1 }
 0x108   :  { %263 = vst.msk [vmem:[%s656_s3 + $0x50] sm:$0xff] %vm252_vm2, %v191_v40  ;;  %v194_v47 = vadd.f32 %v526_v41, %v193_v45  ;;  %v340_v48 = vpop.f32.mrb[23].mxu0  ;;  %277 = vst.msk [vmem:[%s656_s3 + $0xc0] sm:$0xff] %vm252_vm2, %v247_v43  ;;  %v368_v49 = vpop.f32.mrb[23].mxu1 }
 0x10a   :  { %264 = vst.msk [vmem:[%s656_s3 + $0x58] sm:$0xff] %vm252_vm2, %v194_v47 }
 0x10d   :  { %v198_v50 = vpop.f32.mrb[24].mxu0 }
 0x10e   :  { %v199_v51 = vadd.f32 %v526_v41, %v198_v50  ;;  %v343_v52 = vpop.f32.mrb[25].mxu0 }
 0x10f   :  { %v201_v53 = vpop.f32.mrb[26].mxu0 }
 0x110   :  { %265 = vst.msk [vmem:[%s656_s3 + $0x60] sm:$0xff] %vm252_vm2, %v199_v51  ;;  %v202_v54 = vadd.f32 %v526_v41, %v201_v53  ;;  %v344_v55 = vpop.f32.mrb[27].mxu0 }
 0x112   :  { %266 = vst.msk [vmem:[%s656_s3 + $0x68] sm:$0xff] %vm252_vm2, %v202_v54 }

</bundles_post_ra>
